<compile_context>
chip_gen: v7x
topology: tpu7x:2x2x1
jax: 0.10.0
libtpu: 0.0.40
codegen_flags: <defaults>
</compile_context>

<pallas_src>
import functools

import jax
import jax.numpy as jnp
from jax.experimental import pallas as pl
from jax.experimental.pallas import tpu as pltpu


def _pick_c_chunk(C: int) -> int:
    """Largest convenient channel chunk that tiles C exactly (static slices)."""
    for cand in (64, 32, 16, 8):
        if C % cand == 0:
            return cand
    return C  # small / irregular C: single pass over all channels


def _head_kernel(x_ref, wconv_ref, bconv_ref, wfc_ref, bfc_ref, out_ref, *, c_chunk):
    """Fused head: 1x1 conv -> ReLU gate -> elementwise mul -> Linear(C*HW -> 2).

    Per grid step:
      x_ref:     (Bt, C, HW)  VMEM bf16   activation tile (HW on lanes, C on sublanes)
      wconv_ref: (C, HW)      VMEM bf16   1x1 conv weight, pre-broadcast along HW
      bconv_ref: (1,)         SMEM f32    conv bias (scalar)
      wfc_ref:   (2, C, HW)   VMEM bf16   fc weight, lane-dense
      bfc_ref:   (2,)         SMEM f32    fc bias
      out_ref:   (Bt, 2)      VMEM f32
    """
    Bt, C, HW = x_ref.shape
    f32 = jnp.float32

    pre = jnp.zeros((Bt, HW), f32)   # conv pre-activation accumulator
    g0 = jnp.zeros((Bt, HW), f32)    # fc row 0 per-position accumulator
    g1 = jnp.zeros((Bt, HW), f32)    # fc row 1 per-position accumulator

    # One pass over x: each channel chunk is loaded once and feeds all three
    # accumulators (static slices => zero-cost ref views, f32 accumulation).
    for c0 in range(0, C, c_chunk):
        c1 = c0 + c_chunk
        xc = x_ref[:, c0:c1, :].astype(f32)           # (Bt, cc, HW)
        wc = wconv_ref[c0:c1, :].astype(f32)          # (cc, HW)
        w0 = wfc_ref[0, c0:c1, :].astype(f32)         # (cc, HW)
        w1 = wfc_ref[1, c0:c1, :].astype(f32)         # (cc, HW)
        pre = pre + jnp.sum(xc * wc[None, :, :], axis=1)
        g0 = g0 + jnp.sum(xc * w0[None, :, :], axis=1)
        g1 = g1 + jnp.sum(xc * w1[None, :, :], axis=1)

    # Gate: y[b, p] = relu(sum_c x[b, c, p] * w_conv[c] + b_conv)
    y = jnp.maximum(pre + bconv_ref[0], 0.0)           # (Bt, HW)

    # out[b, k] = sum_p y[b, p] * g_k[b, p] + bfc[k]  (z = x*y never materialized)
    o0 = jnp.sum(y * g0, axis=1, keepdims=True)        # (Bt, 1)
    o1 = jnp.sum(y * g1, axis=1, keepdims=True)        # (Bt, 1)
    out_ref[:, 0:1] = o0 + bfc_ref[0]
    out_ref[:, 1:2] = o1 + bfc_ref[1]


def model_head(x_nchw, w_conv, b_conv, w_fc, b_fc, *, b_tile=None,
               act_dtype=jnp.bfloat16):
    """x_nchw: (B, C, 14, 14); w_conv: (1, C, 1, 1); b_conv: (1,);
       w_fc: (2, C*14*14); b_fc: (2,).  Returns (B, 2) f32."""
    B, C, H, W = x_nchw.shape
    HW = H * W
    assert w_fc.shape == (2, C * HW)

    # bf16 in HBM (convert-on-load, f32 accumulate in kernel) halves the
    # dominant HBM traffic and VMEM footprint.
    x = x_nchw.reshape(B, C, HW).astype(act_dtype)
    # Conv weight pre-broadcast along HW so the in-kernel multiply is lane-aligned.
    wconv = jnp.broadcast_to(w_conv.reshape(C, 1), (C, HW)).astype(act_dtype)
    # PyTorch flatten index is c*HW + p, so (2, C*HW) -> (2, C, HW) is a free,
    # lane-dense reshape (size-2 dim stays OFF the lane axis).
    wfc = w_fc.reshape(2, C, HW).astype(act_dtype)
    bconv = b_conv.reshape(1).astype(jnp.float32)
    bfc = b_fc.reshape(2).astype(jnp.float32)

    # --- VMEM-budgeted batch tile (v7x-safe: <= ~40 MB incl. double buffering) ---
    itemsize = jnp.dtype(act_dtype).itemsize
    _pad = lambda n, m: -(-n // m) * m
    lane_hw = _pad(HW, 128)                      # 196 -> 256 (VMEM-only padding)
    c_pad = _pad(C, 8 * (4 // itemsize))         # sublane padding (8 f32 / 16 bf16)
    per_b_bytes = c_pad * lane_hw * itemsize     # one batch row of x in VMEM
    weight_bytes = 3 * c_pad * lane_hw * itemsize  # wconv + 2 fc rows (resident)

    if b_tile is None:
        budget = 40 * 1024 * 1024 - 2 * weight_bytes
        b_tile = max(1, min(64, budget // max(2 * per_b_bytes, 1)))
    bt = int(max(1, min(b_tile, B)))
    grid = (pl.cdiv(B, bt),)   # keep >= 2 (and even) grid steps per TC on v7x when B allows

    # Explicit scoped-VMEM limit so large tiles compile (defaults: 16/32/32 MiB).
    vmem_limit = int(min(
        100 * 1024 * 1024,
        max(16 * 1024 * 1024,
            2 * weight_bytes + 2 * bt * per_b_bytes + (4 << 20))))

    kernel = functools.partial(_head_kernel, c_chunk=_pick_c_chunk(C))

    return pl.pallas_call(
        kernel,
        out_shape=jax.ShapeDtypeStruct((B, 2), jnp.float32),
        grid=grid,
        in_specs=[
            pl.BlockSpec((bt, C, HW), lambda b: (b, 0, 0)),        # x: streamed over batch
            pl.BlockSpec((C, HW), lambda b: (0, 0)),               # conv weight (resident)
            pl.BlockSpec(memory_space=pltpu.MemorySpace.SMEM),     # conv bias (scalar)
            pl.BlockSpec((2, C, HW), lambda b: (0, 0, 0)),         # fc weight (resident)
            pl.BlockSpec(memory_space=pltpu.MemorySpace.SMEM),     # fc bias (2 scalars)
        ],
        out_specs=pl.BlockSpec((bt, 2), lambda b: (b, 0)),
        compiler_params=pltpu.CompilerParams(
            dimension_semantics=("parallel",),
            vmem_limit_bytes=vmem_limit),
    )(x, wconv, bconv, wfc, bfc)


def _reference(x_nchw, w_conv, b_conv, w_fc, b_fc, act_dtype=jnp.bfloat16):
    """Pure-JAX reference matching the PyTorch forward, using the same bf16-rounded
    inputs/weights the kernel consumes (f32 compute)."""
    B, C, H, W = x_nchw.shape
    xf = x_nchw.astype(act_dtype).astype(jnp.float32)
    wcf = w_conv.reshape(C).astype(act_dtype).astype(jnp.float32)
    wff = w_fc.astype(act_dtype).astype(jnp.float32)
    y = jnp.einsum('bchw,c->bhw', xf, wcf) + b_conv.reshape(()).astype(jnp.float32)
    y = jnp.maximum(y, 0.0)[:, None, :, :]
    z = xf * y
    return z.reshape(B, -1) @ wff.T + b_fc.astype(jnp.float32)


if __name__ == "__main__":
    # Small shapes consistent with the module: spatial must be 14 (fc expects C*14*14).
    B, C, H, W = 2, 4, 14, 14

    key = jax.random.PRNGKey(0)
    kx, kw1, kb1, kw2, kb2 = jax.random.split(key, 5)

    x = jax.random.normal(kx, (B, C, H, W), dtype=jnp.float32)
    # Deterministic synthetic parameters (shapes from the module's __init__).
    w_conv = jax.random.normal(kw1, (1, C, 1, 1), dtype=jnp.float32) * 0.1
    b_conv = jax.random.normal(kb1, (1,), dtype=jnp.float32) * 0.1
    w_fc = jax.random.normal(kw2, (2, C * H * W), dtype=jnp.float32) * 0.05
    b_fc = jax.random.normal(kb2, (2,), dtype=jnp.float32) * 0.05

    out = jax.block_until_ready(model_head(x, w_conv, b_conv, w_fc, b_fc))
    ref = _reference(x, w_conv, b_conv, w_fc, b_fc)

    assert out.shape == (B, 2)
    assert jnp.allclose(out, ref, atol=1e-3, rtol=1e-3), (out, ref)

    print("KERNEL_OK")
</pallas_src>

<mosaic_0001>
module attributes {stable_mosaic.version = 11 : i64} {
  func.func @_head_kernel(%arg0: i32, %arg1: memref<2x4x196xbf16, #tpu.memory_space<vmem>>, %arg2: memref<4x196xbf16, #tpu.memory_space<vmem>>, %arg3: memref<1xf32, #tpu.memory_space<smem>>, %arg4: memref<2x4x196xbf16, #tpu.memory_space<vmem>>, %arg5: memref<2xf32, #tpu.memory_space<smem>>, %arg6: memref<2x2xf32, #tpu.memory_space<vmem>>) attributes {dimension_semantics = [#tpu.dimension_semantics<parallel>], iteration_bounds = array<i64: 1>, scalar_prefetch = 0 : i64, scratch_operands = 0 : i64, tpu.core_type = #tpu.core_type<tc>, window_params = [{transform_indices = @transform_0, window_bounds = array<i64: 2, 4, 196>}, {pipeline_mode = #tpu.pipeline_mode<synchronous>, transform_indices = @transform_1, window_bounds = array<i64: 4, 196>}, {transform_indices = @transform_2, window_bounds = array<i64: 1>}, {pipeline_mode = #tpu.pipeline_mode<synchronous>, transform_indices = @transform_3, window_bounds = array<i64: 2, 4, 196>}, {transform_indices = @transform_4, window_bounds = array<i64: 2>}, {transform_indices = @transform_5, window_bounds = array<i64: 2, 2>}]} {
    %cst = arith.constant 0.000000e+00 : f32
    %0 = vector.broadcast %cst : f32 to vector<2x196xf32>
    %cst_0 = arith.constant 0.000000e+00 : f32
    %1 = vector.broadcast %cst_0 : f32 to vector<2x196xf32>
    %cst_1 = arith.constant 0.000000e+00 : f32
    %2 = vector.broadcast %cst_1 : f32 to vector<2x196xf32>
    %c0 = arith.constant 0 : index
    %c0_2 = arith.constant 0 : index
    %c0_3 = arith.constant 0 : index
    %3 = vector.load %arg1[%c0, %c0_2, %c0_3] : memref<2x4x196xbf16, #tpu.memory_space<vmem>>, vector<2x4x196xbf16>
    %4 = arith.extf %3 : vector<2x4x196xbf16> to vector<2x4x196xf32>
    %c0_4 = arith.constant 0 : index
    %c0_5 = arith.constant 0 : index
    %5 = vector.load %arg2[%c0_4, %c0_5] : memref<4x196xbf16, #tpu.memory_space<vmem>>, vector<4x196xbf16>
    %6 = arith.extf %5 : vector<4x196xbf16> to vector<4x196xf32>
    %c0_6 = arith.constant 0 : index
    %c0_7 = arith.constant 0 : index
    %c0_8 = arith.constant 0 : index
    %7 = vector.load %arg4[%c0_6, %c0_7, %c0_8] : memref<2x4x196xbf16, #tpu.memory_space<vmem>>, vector<1x4x196xbf16>
    %8 = vector.shape_cast %7 : vector<1x4x196xbf16> to vector<4x196xbf16>
    %9 = arith.extf %8 : vector<4x196xbf16> to vector<4x196xf32>
    %c1 = arith.constant 1 : index
    %c0_9 = arith.constant 0 : index
    %c0_10 = arith.constant 0 : index
    %10 = vector.load %arg4[%c1, %c0_9, %c0_10] : memref<2x4x196xbf16, #tpu.memory_space<vmem>>, vector<1x4x196xbf16>
    %11 = vector.shape_cast %10 : vector<1x4x196xbf16> to vector<4x196xbf16>
    %12 = arith.extf %11 : vector<4x196xbf16> to vector<4x196xf32>
    %13 = vector.shape_cast %6 : vector<4x196xf32> to vector<1x4x196xf32>
    %14 = vector.broadcast %13 : vector<1x4x196xf32> to vector<2x4x196xf32>
    %15 = arith.mulf %4, %14 : vector<2x4x196xf32>
    %cst_11 = arith.constant dense<0.000000e+00> : vector<2x196xf32>
    %16 = vector.multi_reduction <add>, %15, %cst_11 [1] : vector<2x4x196xf32> to vector<2x196xf32>
    %17 = arith.addf %0, %16 : vector<2x196xf32>
    %18 = vector.shape_cast %9 : vector<4x196xf32> to vector<1x4x196xf32>
    %19 = vector.broadcast %18 : vector<1x4x196xf32> to vector<2x4x196xf32>
    %20 = arith.mulf %4, %19 : vector<2x4x196xf32>
    %cst_12 = arith.constant dense<0.000000e+00> : vector<2x196xf32>
    %21 = vector.multi_reduction <add>, %20, %cst_12 [1] : vector<2x4x196xf32> to vector<2x196xf32>
    %22 = arith.addf %1, %21 : vector<2x196xf32>
    %23 = vector.shape_cast %12 : vector<4x196xf32> to vector<1x4x196xf32>
    %24 = vector.broadcast %23 : vector<1x4x196xf32> to vector<2x4x196xf32>
    %25 = arith.mulf %4, %24 : vector<2x4x196xf32>
    %cst_13 = arith.constant dense<0.000000e+00> : vector<2x196xf32>
    %26 = vector.multi_reduction <add>, %25, %cst_13 [1] : vector<2x4x196xf32> to vector<2x196xf32>
    %27 = arith.addf %2, %26 : vector<2x196xf32>
    %c0_14 = arith.constant 0 : index
    %28 = memref.load %arg3[%c0_14] : memref<1xf32, #tpu.memory_space<smem>>
    %29 = vector.broadcast %28 : f32 to vector<2x196xf32>
    %30 = arith.addf %17, %29 : vector<2x196xf32>
    %cst_15 = arith.constant 0.000000e+00 : f32
    %31 = vector.broadcast %cst_15 : f32 to vector<2x196xf32>
    %32 = arith.maximumf %30, %31 : vector<2x196xf32>
    %33 = arith.mulf %32, %22 : vector<2x196xf32>
    %cst_16 = arith.constant dense<0.000000e+00> : vector<2xf32>
    %34 = vector.multi_reduction <add>, %33, %cst_16 [1] : vector<2x196xf32> to vector<2xf32>
    %35 = vector.shape_cast %34 : vector<2xf32> to vector<2x1xf32>
    %36 = arith.mulf %32, %27 : vector<2x196xf32>
    %cst_17 = arith.constant dense<0.000000e+00> : vector<2xf32>
    %37 = vector.multi_reduction <add>, %36, %cst_17 [1] : vector<2x196xf32> to vector<2xf32>
    %38 = vector.shape_cast %37 : vector<2xf32> to vector<2x1xf32>
    %c0_18 = arith.constant 0 : index
    %39 = memref.load %arg5[%c0_18] : memref<2xf32, #tpu.memory_space<smem>>
    %40 = vector.broadcast %39 : f32 to vector<2x1xf32>
    %41 = arith.addf %35, %40 : vector<2x1xf32>
    %c0_19 = arith.constant 0 : index
    %c0_20 = arith.constant 0 : index
    %42 = vector.load %arg6[%c0_19, %c0_20] : memref<2x2xf32, #tpu.memory_space<vmem>>, vector<2x1xf32>
    tpu.vector_store %arg6[%c0_19, %c0_20], %41 {strides = array<i32>} : memref<2x2xf32, #tpu.memory_space<vmem>>, vector<2x1xf32>,
    %c1_21 = arith.constant 1 : index
    %43 = memref.load %arg5[%c1_21] : memref<2xf32, #tpu.memory_space<smem>>
    %44 = vector.broadcast %43 : f32 to vector<2x1xf32>
    %45 = arith.addf %38, %44 : vector<2x1xf32>
    %c0_22 = arith.constant 0 : index
    %c1_23 = arith.constant 1 : index
    %46 = vector.load %arg6[%c0_22, %c1_23] : memref<2x2xf32, #tpu.memory_space<vmem>>, vector<2x1xf32>
    tpu.vector_store %arg6[%c0_22, %c1_23], %45 {strides = array<i32>} : memref<2x2xf32, #tpu.memory_space<vmem>>, vector<2x1xf32>,
    return
  }
  func.func @transform_0(%arg0: i32) -> (i32, i32, i32) {
    %c0_i32 = arith.constant 0 : i32
    %c0_i32_0 = arith.constant 0 : i32
    %c0_i32_1 = arith.constant 0 : i32
    return %arg0, %c0_i32, %c0_i32_0 : i32, i32, i32
  }
  func.func @transform_1(%arg0: i32) -> (i32, i32) {
    %c0_i32 = arith.constant 0 : i32
    %c0_i32_0 = arith.constant 0 : i32
    %c0_i32_1 = arith.constant 0 : i32
    return %c0_i32, %c0_i32_0 : i32, i32
  }
  func.func @transform_2(%arg0: i32) -> i32 {
    %c0_i32 = arith.constant 0 : i32
    %c0_i32_0 = arith.constant 0 : i32
    return %c0_i32 : i32
  }
  func.func @transform_3(%arg0: i32) -> (i32, i32, i32) {
    %c0_i32 = arith.constant 0 : i32
    %c0_i32_0 = arith.constant 0 : i32
    %c0_i32_1 = arith.constant 0 : i32
    %c0_i32_2 = arith.constant 0 : i32
    return %c0_i32, %c0_i32_0, %c0_i32_1 : i32, i32, i32
  }
  func.func @transform_4(%arg0: i32) -> i32 {
    %c0_i32 = arith.constant 0 : i32
    %c0_i32_0 = arith.constant 0 : i32
    return %c0_i32 : i32
  }
  func.func @transform_5(%arg0: i32) -> (i32, i32) {
    %c0_i32 = arith.constant 0 : i32
    %c0_i32_0 = arith.constant 0 : i32
    return %arg0, %c0_i32 : i32, i32
  }
}

</mosaic_0001>

<bundles_post_ra>
// kernel: tpu_custom_call.1
= control target key start
LH: loop header
LB: loop body
LE: loop exit
PB: predicated region body
PF: predicated region fallthrough
CT: control target
= control target key end

     0   :  { %11 = vsyncpa [#allocation4], 0  ;;  %s487_s0 = inlined_call_operand.hbm [shape: bf16[2,4,196], index: 0, kind: input, shape index: {}]   ;;  %s488_s1 = inlined_call_operand.hbm [shape: bf16[4,196], index: 1, kind: input, shape index: {}]   ;;  %s489_s2 = inlined_call_operand.<no memory space> [shape: f32[1], index: 2, kind: input, shape index: {}]   ;;  %s490_s3 = inlined_call_operand.vmem [shape: bf16[2,4,196], index: 3, kind: input, shape index: {}]   ;;  %s491_s4 = inlined_call_operand.vmem [shape: f32[2], index: 4, kind: input, shape index: {}]   ;;  %s492_s5 = inlined_call_operand.hbm [shape: f32[2,2], index: 5, kind: output, shape index: {}]  }
   0x1   :  { %12 = vsyncpa [#allocation8], 0 }
   0x2   :  { %13 = vsyncpa [#allocation6], 0 }
   0x3   :  { %14 = vsyncpa [#allocation5], 0  ;;  %s370_s18 = smov [#allocation3]   ;;  %s284_s22 = scalar_lea.hbm %s487_s0, 128 }
   0x4   :  { %s20_s19 = sshll.u32 %s370_s18, 4  ;;  %p285_p0 = scmp.ne.s32.totalorder %s487_s0, %s284_s22  ;;  %s21_s19 = int_to_ptr.vmem [resolvable:$true] %s20_s19 }
   0x5   :  { %p288_p1 = scmp.lt.u32.totalorder %s284_s22, %s487_s0 }
   0x7   :  { %p290_p2 = pnand %p288_p1, %p285_p0 }
   0x9   :  { %293 = shalt.err (!%p290_p2)
}
   0xa   :  { %s294_s27 = scalar_lea.vmem %s21_s19, 128  ;;  %p299_p4 = scmp.lt.s32.totalorder %s21_s19, %s21_s19 }
   0xb   :  { %p295_p3 = scmp.ne.s32.totalorder %s21_s19, %s294_s27  ;;  %p300_p5 = scmp.lt.s32.totalorder %s294_s27, %s294_s27 }
   0xd   :  { %p301_p6 = por %p300_p5, %p299_p4 }
   0xf   :  { %p302_p7 = pnand %p301_p6, %p295_p3 }
  0x11   :  { %305 = shalt.err (!%p302_p7)
}
  0x12   :  { %s371_s28 = smov 64   ;;  %s372_s29 = smov 4  }
  0x13   :  { %26 = dma.hbm_to_vmem [thread:$0]  %s487_s0, 128, %s21_s19, [#allocation4], %s371_s28, %s371_s28, %s372_s29  }
  0x14   :  { %s373_s7 = smov [#allocation7]   ;;  %s47_s11 = sshll.u32 %s491_s4, 4  ;;  %s48_s11 = int_to_ptr.vmem [resolvable:$true] %s47_s11 }
  0x15   :  { %s33_s8 = sshll.u32 %s373_s7, 4  ;;  %s306_s14 = scalar_lea.hbm %s488_s1, 64  ;;  %s34_s8 = int_to_ptr.vmem [resolvable:$true] %s33_s8 }
  0x16   :  { %p307_p8 = scmp.ne.s32.totalorder %s488_s1, %s306_s14  ;;  %p310_p9 = scmp.lt.u32.totalorder %s306_s14, %s488_s1 }
  0x18   :  { %p312_p10 = pnand %p310_p9, %p307_p8 }
  0x1a   :  { %315 = shalt.err (!%p312_p10)
}
  0x1b   :  { %s316_s0 = scalar_lea.vmem %s34_s8, 64  ;;  %p321_p12 = scmp.lt.s32.totalorder %s34_s8, %s34_s8 }
  0x1c   :  { %p317_p11 = scmp.ne.s32.totalorder %s34_s8, %s316_s0  ;;  %p322_p13 = scmp.lt.s32.totalorder %s316_s0, %s316_s0 }
  0x1e   :  { %p323_p0 = por %p322_p13, %p321_p12 }
  0x20   :  { %p324_p1 = pnand %p323_p0, %p317_p11 }
  0x22   :  { %327 = shalt.err (!%p324_p1)
}
  0x23   :  { %36 = dma.hbm_to_vmem [thread:$0]  %s488_s1, 64, %s34_s8, [#allocation8]  }
  0x24   :  { %s328_s20 = scalar_lea.vmem %s48_s11, 16  ;;  %p333_p3 = scmp.lt.s32.totalorder %s48_s11, %s48_s11 }
  0x25   :  { %p329_p2 = scmp.ne.s32.totalorder %s48_s11, %s328_s20  ;;  %p334_p4 = scmp.lt.s32.totalorder %s328_s20, %s328_s20 }
  0x27   :  { %p335_p5 = por %p334_p4, %p333_p3 }
  0x29   :  { %p336_p6 = pnand %p335_p5, %p329_p2 }
  0x2b   :  { %339 = shalt.err (!%p336_p6)
}
  0x2c   :  { %s374_s21 = smov [#allocation9]  }
  0x2d   :  { %50 = dma.vmem_to_smem %s48_s11, 16, %s374_s21, [#allocation6]  }
  0x2e   :  { %362 = dma.done.wait [#allocation4], 128  }
  0x2f   :  { %363 = vsyncadd [#allocation4], 4294967168 }
  0x30   :  { %364 = dma.done.wait [#allocation8], 64  }
  0x31   :  { %365 = vsyncadd [#allocation8], 4294967232 }
  0x32   :  { %366 = dma.done.wait [#allocation6], 16  }
  0x33   :  { %367 = vsyncadd [#allocation6], 4294967280 }
  0x34   :  { %60 = sfence }
  0x35   :  { %v271_v0 = vld [vmem:[#allocation3] sm:$0xff]   ;;  %v65_v1 = vld [vmem:[#allocation7] sm:$0xf]  ;;  %vm80_vm0 = vcmask 1043456   ;;  %vm88_vm1 = vcmask 551936   ;;  %v439_v12 = vstv %s489_s2  ;;  %vm212_vm2 = vcmask 1041409  }
  0x36   :  { %v275_v2 = vld [vmem:[%s490_s3] sm:$0xff]   ;;  %v272_v3 = vunpack.c.l.bf16 %v271_v0  ;;  %v273_v4 = vunpack.c.h.bf16 %v271_v0  ;;  %v66_v5 = vunpack.c.l.bf16 %v65_v1  ;;  %vm217_vm3 = vcmask 1041408   ;;  %s241_s2 = sld [smem:[#allocation9]]  ;;  %s269_s3 = sld [smem:[#allocation9 + $0x1]] }
  0x37   :  { %v276_v6 = vunpack.c.l.bf16 %v275_v2  ;;  %v277_v7 = vunpack.c.h.bf16 %v275_v2  ;;  %vm219_vm4 = vcmask 549888   ;;  %vm244_vm5 = vcmask 1024   ;;  %s375_s25 = smov [#allocation10]  }
  0x38   :  { %v72_v8 = vmul.f32 %v272_v3, %v66_v5  ;;  %v73_v9 = vmul.f32 %v273_v4, %v66_v5  ;;  %s257_s26 = sshll.u32 %s375_s25, 4  ;;  %vm249_vm6 = vcmask 9224   ;;  %s258_s26 = int_to_ptr.vmem [resolvable:$true] %s257_s26 }
  0x39   :  { %v114_v10 = vmul.f32 %v276_v6, %v272_v3  ;;  %v115_v11 = vmul.f32 %v276_v6, %v273_v4  ;;  %v441_v13 = vmul.f32 %v277_v7, %v272_v3  ;;  %v443_v14 = vmul.f32 %v277_v7, %v273_v4  ;;  %s340_s27 = scalar_lea.vmem %s258_s26, 32  ;;  %p345_p8 = scmp.lt.s32.totalorder %s258_s26, %s258_s26 }
  0x3a   :  { %v76_v15 = vcombine.high %v72_v8, %v72_v8  ;;  %v77_v16 = vcombine.high %v73_v9, %v73_v9  ;;  %v81_v17 = vsel %vm80_vm0, %v72_v8, 0.0  ;;  %v96_v18 = vsel %vm80_vm0, %v73_v9, 0.0  ;;  %p341_p7 = scmp.ne.s32.totalorder %s258_s26, %s340_s27  ;;  %p346_p9 = scmp.lt.s32.totalorder %s340_s27, %s340_s27 }
  0x3b   :  { %v82_v19 = vrot.slane %v81_v17, 4  ;;  %v97_v20 = vrot.slane %v96_v18, 4  ;;  %v118_v21 = vcombine.high %v114_v10, %v114_v10  ;;  %v119_v22 = vcombine.high %v115_v11, %v115_v11 }
  0x3c   :  { %v89_v23 = vsel %vm88_vm1, %v76_v15, 0.0  ;;  %v103_v24 = vsel %vm88_vm1, %v77_v16, 0.0  ;;  %v122_v25 = vsel %vm80_vm0, %v114_v10, 0.0  ;;  %v136_v26 = vsel %vm80_vm0, %v115_v11, 0.0  ;;  %p347_p10 = por %p346_p9, %p345_p8 }
  0x3d   :  { %v83_v27 = vadd.f32 %v82_v19, %v81_v17  ;;  %v90_v28 = vrot.slane %v89_v23, 4  ;;  %v98_v29 = vadd.f32 %v97_v20, %v96_v18  ;;  %v104_v30 = vrot.slane %v103_v24, 4 }
  0x3e   :  { %v123_v31 = vrot.slane %v122_v25, 4  ;;  %v129_v32 = vsel %vm88_vm1, %v118_v21, 0.0  ;;  %v137_v33 = vrot.slane %v136_v26, 4  ;;  %v143_v34 = vsel %vm88_vm1, %v119_v22, 0.0  ;;  %p348_p11 = pnand %p347_p10, %p341_p7 }
  0x3f   :  { %v84_v35 = vrot.slane %v83_v27, 2  ;;  %v91_v36 = vadd.f32 %v90_v28, %v89_v23  ;;  %v99_v37 = vrot.slane %v98_v29, 2  ;;  %v105_v38 = vadd.f32 %v104_v30, %v103_v24 }
  0x40   :  { %v124_v39 = vadd.f32 %v123_v31, %v122_v25  ;;  %v130_v40 = vrot.slane %v129_v32, 4  ;;  %v138_v41 = vadd.f32 %v137_v33, %v136_v26  ;;  %v144_v42 = vrot.slane %v143_v34, 4 }
  0x41   :  { %v85_v43 = vadd.f32 %v84_v35, %v83_v27  ;;  %v92_v44 = vrot.slane %v91_v36, 2  ;;  %v100_v45 = vadd.f32 %v99_v37, %v98_v29  ;;  %v106_v46 = vrot.slane %v105_v38, 2 }
  0x42   :  { %v125_v47 = vrot.slane %v124_v39, 2  ;;  %v131_v48 = vadd.f32 %v130_v40, %v129_v32  ;;  %v139_v49 = vrot.slane %v138_v41, 2  ;;  %v145_v50 = vadd.f32 %v144_v42, %v143_v34 }
  0x43   :  { %v86_v51 = vrot.slane %v85_v43, 1  ;;  %v93_v52 = vadd.f32 %v92_v44, %v91_v36  ;;  %v101_v53 = vrot.slane %v100_v45, 1  ;;  %v107_v54 = vadd.f32 %v106_v46, %v105_v38 }
  0x44   :  { %v126_v55 = vadd.f32 %v125_v47, %v124_v39  ;;  %v132_v56 = vrot.slane %v131_v48, 2  ;;  %v140_v57 = vadd.f32 %v139_v49, %v138_v41  ;;  %v146_v58 = vrot.slane %v145_v50, 2 }
  0x45   :  { %v87_v59 = vadd.f32 %v86_v51, %v85_v43  ;;  %v94_v60 = vrot.slane %v93_v52, 1  ;;  %v102_v61 = vadd.f32 %v101_v53, %v100_v45  ;;  %v108_v62 = vrot.slane %v107_v54, 1 }
  0x46   :  { %v127_v63 = vrot.slane %v126_v55, 1  ;;  %v133_v0 = vadd.f32 %v132_v56, %v131_v48  ;;  %v141_v1 = vrot.slane %v140_v57, 1  ;;  %v147_v2 = vadd.f32 %v146_v58, %v145_v50 }
  0x47   :  { %v95_v3 = vadd.f32 %v94_v60, %v93_v52  ;;  %v109_v4 = vadd.f32 %v108_v62, %v107_v54  ;;  %v196_v5 = vadd.f32 %v439_v12, %v87_v59  ;;  %v198_v6 = vadd.f32 %v439_v12, %v102_v61 }
  0x48   :  { %v128_v7 = vadd.f32 %v127_v63, %v126_v55  ;;  %v134_v8 = vrot.slane %v133_v0, 1  ;;  %v142_v9 = vadd.f32 %v141_v1, %v140_v57  ;;  %v148_v10 = vrot.slane %v147_v2, 1 }
  0x49   :  { %v197_v11 = vadd.f32 %v439_v12, %v95_v3  ;;  %v199_v15 = vadd.f32 %v439_v12, %v109_v4  ;;  %v200_v16 = vmax.f32 %v196_v5, 0.0  ;;  %v202_v17 = vmax.f32 %v198_v6, 0.0 }
  0x4a   :  { %v135_v18 = vadd.f32 %v134_v8, %v133_v0  ;;  %v149_v19 = vadd.f32 %v148_v10, %v147_v2  ;;  %v158_v20 = vcombine.high %v441_v13, %v441_v13  ;;  %v159_v21 = vcombine.high %v443_v14, %v443_v14 }
  0x4b   :  { %v201_v22 = vmax.f32 %v197_v11, 0.0  ;;  %v203_v23 = vmax.f32 %v199_v15, 0.0  ;;  %v204_v24 = vmul.f32 %v200_v16, %v128_v7  ;;  %v206_v25 = vmul.f32 %v202_v17, %v142_v9 }
  0x4c   :  { %v162_v26 = vsel %vm80_vm0, %v441_v13, 0.0  ;;  %v169_v27 = vsel %vm88_vm1, %v158_v20, 0.0  ;;  %v176_v12 = vsel %vm80_vm0, %v443_v14, 0.0  ;;  %v183_v28 = vsel %vm88_vm1, %v159_v21, 0.0 }
  0x4d   :  { %v205_v29 = vmul.f32 %v201_v22, %v135_v18  ;;  %v207_v30 = vmul.f32 %v203_v23, %v149_v19  ;;  %v213_v31 = vsel %vm212_vm2, %v206_v25, %v204_v24  ;;  %v163_v32 = vrot.slane %v162_v26, 4 }
  0x4e   :  { %v218_v33 = vsel %vm217_vm3, %v213_v31, 0.0  ;;  %v170_v34 = vrot.slane %v169_v27, 4  ;;  %v177_v35 = vrot.slane %v176_v12, 4  ;;  %v184_v36 = vrot.slane %v183_v28, 4 }
  0x4f   :  { %v214_v37 = vsel %vm212_vm2, %v207_v30, %v205_v29  ;;  %v164_v13 = vadd.f32 %v163_v32, %v162_v26  ;;  %v242_v3 = vstv %s241_s2  ;;  %v247_v6 = vstv %s269_s3 }
  0x50   :  { %v220_v38 = vsel %vm219_vm4, %v214_v37, 0.0  ;;  %v171_v39 = vadd.f32 %v170_v34, %v169_v27  ;;  %v178_v40 = vadd.f32 %v177_v35, %v176_v12  ;;  %v185_v14 = vadd.f32 %v184_v36, %v183_v28 }
  0x51   :  { %v221_v41 = vadd.f32 %v220_v38, %v218_v33  ;;  %v165_v42 = vrot.slane %v164_v13, 2 }
  0x52   :  { %v172_v43 = vrot.slane %v171_v39, 2  ;;  %v179_v44 = vrot.slane %v178_v40, 2  ;;  %v186_v45 = vrot.slane %v185_v14, 2 }
  0x53   :  { %222 = vadd.xlane.f32.xlu0 %v221_v41  ;;  %v166_v46 = vadd.f32 %v165_v42, %v164_v13 }
  0x54   :  { %v173_v47 = vadd.f32 %v172_v43, %v171_v39  ;;  %v180_v48 = vadd.f32 %v179_v44, %v178_v40  ;;  %v187_v49 = vadd.f32 %v186_v45, %v185_v14 }
  0x55   :  { %v167_v50 = vrot.slane %v166_v46, 1 }
  0x56   :  { %v174_v51 = vrot.slane %v173_v47, 1  ;;  %v181_v52 = vrot.slane %v180_v48, 1  ;;  %v188_v53 = vrot.slane %v187_v49, 1 }
  0x57   :  { %v168_v54 = vadd.f32 %v167_v50, %v166_v46 }
  0x58   :  { %v175_v55 = vadd.f32 %v174_v51, %v173_v47  ;;  %v182_v56 = vadd.f32 %v181_v52, %v180_v48  ;;  %v189_v57 = vadd.f32 %v188_v53, %v187_v49 }
  0x59   :  { %v224_v58 = vmul.f32 %v200_v16, %v168_v54 }
  0x5a   :  { %v225_v59 = vmul.f32 %v201_v22, %v175_v55  ;;  %v226_v60 = vmul.f32 %v202_v17, %v182_v56  ;;  %v227_v61 = vmul.f32 %v203_v23, %v189_v57 }
  0x5c   :  { %v232_v62 = vsel %vm212_vm2, %v226_v60, %v224_v58  ;;  %v233_v63 = vsel %vm212_vm2, %v227_v61, %v225_v59 }
  0x5d   :  { %v236_v0 = vsel %vm217_vm3, %v232_v62, 0.0  ;;  %v237_v1 = vsel %vm219_vm4, %v233_v63, 0.0 }
  0x5e   :  { %v238_v2 = vadd.f32 %v237_v1, %v236_v0 }
  0x60   :  { %239 = vadd.xlane.f32.xlu0 %v238_v2 }
  0xe0   :  { %v223_v4 = vpop.xlane.xlu0 %222 }
  0xe1   :  { %v243_v5 = vadd.f32 %v242_v3, %v223_v4 }
  0xe3   :  { %245 = vst.msk [vmem:[#allocation10] sm:$0x3] %vm244_vm5, %v243_v5 }
  0xed   :  { %v240_v7 = vpop.xlane.xlu0 %239 }
  0xee   :  { %v248_v8 = vadd.f32 %v247_v6, %v240_v7 }
  0xf0   :  { %250 = vst.msk [vmem:[#allocation10] sm:$0x3] %vm249_vm6, %v248_v8 }
  0xf1   :  { %351 = shalt.err (!%p348_p11)
}
  0xf2   :  { %s352_s30 = scalar_lea.hbm %s492_s5, 32 }
  0xf3   :  { %p353_p12 = scmp.ne.s32.totalorder %s492_s5, %s352_s30  ;;  %p356_p13 = scmp.lt.u32.totalorder %s352_s30, %s492_s5 }
  0xf5   :  { %p358_p0 = pnand %p356_p13, %p353_p12 }
  0xf7   :  { %361 = shalt.err (!%p358_p0)
}
  0xf8   :  { %260 = dma.vmem_to_hbm [thread:$0]  %s258_s26, 32, %s492_s5, [#allocation5]  }
  0xf9   :  { %368 = dma.done.wait [#allocation5], 32  }
  0xfa   :  { %369 = vsyncadd [#allocation5], 4294967264 }
  0xfb   :  { %264 = vsyncpa [#allocation4], 1 }
  0xfc   :  { %265 = vsyncpa [#allocation8], 1 }
  0xfd   :  { %266 = vsyncpa [#allocation5], 1 }
  0xfe   :  { %267 = vsyncpa [#allocation6], 1 }

</bundles_post_ra>
